<compile_context>
chip_gen: v5e
topology: v5e:2x2
jax: 0.10.0
libtpu: 0.0.40
codegen_flags: <defaults>
</compile_context>

<pallas_src>
import jax
import jax.numpy as jnp
from jax import lax
from jax.experimental import pallas as pl
from jax.experimental.pallas import tpu as pltpu


def _round_up(x, m):
    return ((x + m - 1) // m) * m


def _cdiv(a, b):
    return (a + b - 1) // b


def _vmem_cap_bytes():
    # Generation-aware physical VMEM (v5e/v6e: 128 MiB, v7x: 64 MiB); fall back to the
    # most restrictive (v7x) value if the query is unavailable.
    try:
        return int(pltpu.get_tpu_info().vmem_capacity_bytes)
    except Exception:
        return 64 * 1024 * 1024


# ---------------------------- fused forward pass ----------------------------
def voice_conv_transpose2d(x, weight, bias, gamma, beta, *, stride=1, padding=0,
                           output_padding=0, dilation=1):
    """ConvTranspose2d (groups=1, NCHW, PyTorch weight layout (Cin, Cout, Kh, Kw))
    followed by `res * gamma + beta` (gamma/beta: (1, Cout, 1, Wout)), fused into a
    single Pallas TPU kernel (matmul -> phase-decomposed col2im -> affine -> one store)."""
    N, Cin, Hin, Win = x.shape
    Cin_w, Cout, Kh, Kw = weight.shape
    assert Cin == Cin_w
    s, p, op, d = stride, padding, output_padding, dilation

    Hout = (Hin - 1) * s - 2 * p + d * (Kh - 1) + op + 1
    Wout = (Win - 1) * s - 2 * p + d * (Kw - 1) + op + 1
    Hfull = (Hin - 1) * s + d * (Kh - 1) + 1 + op
    Wfull = (Win - 1) * s + d * (Kw - 1) + 1 + op

    # ---- static layout parameters ----
    win_p = _round_up(Win, 8)            # zero-pad input width: tile-aligned reshapes; pad rows contribute 0
    cin_pad = _round_up(Cin, 16)         # bf16 packs (16, 128) per vreg (review: not 8, never 128)
    cout_pad = _round_up(Cout, 128)      # lane-dense channel dim everywhere in-kernel
    s2 = s * s
    # Phase plane (ph_h, ph_w) holds buf[s*hq + ph_h, s*wq + ph_w]; every tap lands as a
    # dense shifted add at (off_h, off_w) = (kh*d//s, kw*d//s) inside its phase plane.
    Hq = max((d * (Kh - 1)) // s + Hin, _cdiv(Hfull, s))
    Wq = _round_up(max((d * (Kw - 1)) // s + win_p, _cdiv(Wfull, s)), 8)

    # ---- host-side operand prep (tiny, one-time layout work) ----
    x_nhwc = jnp.transpose(x, (0, 2, 3, 1))                                    # (N,Hin,Win,Cin)
    x_nhwc = jnp.pad(x_nhwc, ((0, 0), (0, 0), (0, win_p - Win), (0, cin_pad - Cin)))
    x_flat = x_nhwc.reshape(N, Hin * win_p, cin_pad).astype(jnp.bfloat16)

    w_taps = jnp.transpose(weight, (2, 3, 0, 1)).reshape(Kh * Kw, Cin, Cout)   # (taps,Cin,Cout)
    w_taps = jnp.pad(w_taps, ((0, 0), (0, cin_pad - Cin), (0, cout_pad - Cout)))
    w_taps = w_taps.astype(jnp.bfloat16)

    # gamma / beta_eff in phase-plane layout: plane[ph_w][wq, c] applies to wo = s*wq + ph_w - p.
    gamma_wc = jnp.transpose(gamma[0, :, 0, :], (1, 0)).astype(jnp.float32)    # (Wout, Cout)
    beta_wc = jnp.transpose(beta[0, :, 0, :], (1, 0)).astype(jnp.float32)
    beta_eff_wc = beta_wc + bias[None, :].astype(jnp.float32) * gamma_wc       # bias folded in
    wo = s * jnp.arange(Wq)[None, :] + jnp.arange(s)[:, None] - p              # (s, Wq)
    valid = (wo >= 0) & (wo < Wout)
    wo_c = jnp.clip(wo, 0, Wout - 1)
    g_planes = jnp.where(valid[..., None], jnp.take(gamma_wc, wo_c, axis=0), 0.0)
    b_planes = jnp.where(valid[..., None], jnp.take(beta_eff_wc, wo_c, axis=0), 0.0)
    g_planes = jnp.pad(g_planes, ((0, 0), (0, 0), (0, cout_pad - Cout)))       # (s, Wq, cp)
    b_planes = jnp.pad(b_planes, ((0, 0), (0, 0), (0, cout_pad - Cout)))
    g_planes = jnp.tile(g_planes, (s, 1, 1)).astype(jnp.float32)               # idx = ph_h*s + ph_w
    b_planes = jnp.tile(b_planes, (s, 1, 1)).astype(jnp.float32)

    # ---- fused kernel: per-tap MXU matmul -> phase-plane accumulate -> affine -> store ----
    def kernel(x_ref, w_ref, g_ref, b_ref, o_ref):
        o_ref[...] = jnp.zeros_like(o_ref)
        xb = x_ref[0]                                                 # (Hin*win_p, cin_pad) bf16
        for kh in range(Kh):
            for kw in range(Kw):
                tap = kh * Kw + kw
                # Tiny-K MXU matmul (bf16 in, f32 acc); op is memory-bound, MXU
                # under-utilization at K=cin_pad is fine (review item 12).
                z = jnp.dot(xb, w_ref[tap], preferred_element_type=jnp.float32)
                z3 = z.reshape(Hin, win_p, cout_pad)                  # tile-aligned (win_p % 8 == 0)
                ph = ((kh * d) % s) * s + ((kw * d) % s)
                oh = (kh * d) // s
                ow = (kw * d) // s
                r0 = ph * Hq + oh
                o_ref[0, r0:r0 + Hin, ow:ow + win_p, :] += z3         # dense (unstrided) add
        for idx in range(s2):                                         # finalize: affine per phase
            r0 = idx * Hq
            o_ref[0, r0:r0 + Hq, :, :] = (o_ref[0, r0:r0 + Hq, :, :] * g_ref[idx][None]
                                          + b_ref[idx][None])

    # VMEM budget: double-buffered inputs + output block (no scratch), generation-aware cap.
    blk_bytes = (Hin * win_p * cin_pad * 2                 # x block (bf16)
                 + Kh * Kw * cin_pad * cout_pad * 2        # weight taps (bf16)
                 + 2 * s2 * Wq * cout_pad * 4              # gamma + beta planes (f32)
                 + s2 * Hq * Wq * cout_pad * 4)            # output block (f32)
    footprint = 2 * blk_bytes                              # default double buffering
    cap = _vmem_cap_bytes()
    vmem_limit = max(int(1.25 * footprint), 16 * 1024 * 1024)
    vmem_limit = min(vmem_limit, (3 * cap) // 4)
    vmem_limit = max(vmem_limit, footprint)                # never request less than the blocks need

    planes = pl.pallas_call(
        kernel,
        out_shape=jax.ShapeDtypeStruct((N, s2 * Hq, Wq, cout_pad), jnp.float32),
        grid_spec=pltpu.PrefetchScalarGridSpec(
            num_scalar_prefetch=0,
            grid=(N,),
            in_specs=[
                pl.BlockSpec((1, Hin * win_p, cin_pad), lambda n: (n, 0, 0)),
                pl.BlockSpec((Kh * Kw, cin_pad, cout_pad), lambda n: (0, 0, 0)),
                pl.BlockSpec((s2, Wq, cout_pad), lambda n: (0, 0, 0)),
                pl.BlockSpec((s2, Wq, cout_pad), lambda n: (0, 0, 0)),
            ],
            out_specs=pl.BlockSpec((1, s2 * Hq, Wq, cout_pad), lambda n: (n, 0, 0, 0)),
        ),
        compiler_params=pltpu.CompilerParams(
            dimension_semantics=("parallel",),
            vmem_limit_bytes=int(vmem_limit),
        ),
    )(x_flat, w_taps, g_planes, b_planes)

    # ---- phase interleave + crop + NCHW: one fused XLA copy pass over the (small) output.
    # TODO(synk): fold this relayout into the kernel epilogue (write NCHW directly).
    planes = planes.reshape(N, s, s, Hq, Wq, cout_pad)
    buf = jnp.transpose(planes, (0, 3, 1, 4, 2, 5)).reshape(N, Hq * s, Wq * s, cout_pad)
    out_nhwc = buf[:, p:p + Hout, p:p + Wout, :Cout]
    return jnp.transpose(out_nhwc, (0, 3, 1, 2))            # NCHW, f32


# ---------------------- pure-JAX reference (check) ----------------------
def _reference(x, weight, bias, gamma, beta, *, stride, padding, output_padding, dilation):
    Cin, Cout, Kh, Kw = weight.shape
    w_flip = jnp.flip(weight, axis=(2, 3))
    w_oihw = jnp.transpose(w_flip, (1, 0, 2, 3))             # (Cout, Cin, Kh, Kw)
    pad_h = (dilation * (Kh - 1) - padding,
             dilation * (Kh - 1) - padding + output_padding)
    pad_w = (dilation * (Kw - 1) - padding,
             dilation * (Kw - 1) - padding + output_padding)
    conv = lax.conv_general_dilated(
        x, w_oihw, window_strides=(1, 1), padding=(pad_h, pad_w),
        lhs_dilation=(stride, stride), rhs_dilation=(dilation, dilation),
        dimension_numbers=("NCHW", "OIHW", "NCHW"))
    conv = conv + bias[None, :, None, None]
    return conv * gamma + beta


if __name__ == "__main__":
    # Module config (small, consistent with the PyTorch module's __init__)
    in_channels, out_channels = 4, 6
    kernel_size, stride, padding, output_padding, dilation = 3, 2, 1, 1, 1
    N, Hin, Win = 2, 8, 8
    Hout = (Hin - 1) * stride - 2 * padding + dilation * (kernel_size - 1) + output_padding + 1
    Wout = (Win - 1) * stride - 2 * padding + dilation * (kernel_size - 1) + output_padding + 1
    out_width = Wout

    key = jax.random.PRNGKey(0)
    kx, kw, kb, kg, kbt = jax.random.split(key, 5)
    x = jax.random.normal(kx, (N, in_channels, Hin, Win), dtype=jnp.float32)
    # PyTorch ConvTranspose2d weight shape: (in_channels, out_channels/groups, Kh, Kw)
    weight = 0.1 * jax.random.normal(
        kw, (in_channels, out_channels, kernel_size, kernel_size), dtype=jnp.float32)
    bias = 0.1 * jax.random.normal(kb, (out_channels,), dtype=jnp.float32)
    # Parameters (module inits gamma=1, beta=0; perturb so the affine path is exercised)
    gamma = 1.0 + 0.1 * jax.random.normal(kg, (1, out_channels, 1, out_width), dtype=jnp.float32)
    beta = 0.1 * jax.random.normal(kbt, (1, out_channels, 1, out_width), dtype=jnp.float32)

    fwd = jax.jit(voice_conv_transpose2d,
                  static_argnames=("stride", "padding", "output_padding", "dilation"))
    out = fwd(x, weight, bias, gamma, beta,
              stride=stride, padding=padding,
              output_padding=output_padding, dilation=dilation)
    out = jax.block_until_ready(out)

    ref = _reference(
        x, weight, bias, gamma, beta,
        stride=stride, padding=padding, output_padding=output_padding, dilation=dilation)
    ref = jax.block_until_ready(ref)

    assert out.shape == (N, out_channels, Hout, Wout), out.shape
    # bf16 MXU inputs (f32 accumulation) -> slightly relaxed tolerance vs. the f32 reference.
    assert jnp.allclose(out, ref, atol=2e-2, rtol=2e-2), float(jnp.max(jnp.abs(out - ref)))
    print("KERNEL_OK")
</pallas_src>

<mosaic_0001>
module attributes {stable_mosaic.version = 11 : i64} {
  func.func @kernel(%arg0: i32, %arg1: memref<1x64x16xbf16, #tpu.memory_space<vmem>>, %arg2: memref<9x16x128xbf16, #tpu.memory_space<vmem>>, %arg3: memref<4x16x128xf32, #tpu.memory_space<vmem>>, %arg4: memref<4x16x128xf32, #tpu.memory_space<vmem>>, %arg5: memref<1x36x16x128xf32, #tpu.memory_space<vmem>>) attributes {dimension_semantics = [#tpu.dimension_semantics<parallel>], iteration_bounds = array<i64: 2>, scalar_prefetch = 0 : i64, scratch_operands = 0 : i64, tpu.core_type = #tpu.core_type<tc>, window_params = [{transform_indices = @transform_0, window_bounds = array<i64: 1, 64, 16>}, {pipeline_mode = #tpu.pipeline_mode<synchronous>, transform_indices = @transform_1, window_bounds = array<i64: 9, 16, 128>}, {pipeline_mode = #tpu.pipeline_mode<synchronous>, transform_indices = @transform_2, window_bounds = array<i64: 4, 16, 128>}, {pipeline_mode = #tpu.pipeline_mode<synchronous>, transform_indices = @transform_3, window_bounds = array<i64: 4, 16, 128>}, {transform_indices = @transform_4, window_bounds = array<i64: 1, 36, 16, 128>}]} {
    %cst = arith.constant 0.000000e+00 : f32
    %0 = vector.broadcast %cst : f32 to vector<1x36x16x128xf32>
    %c0 = arith.constant 0 : index
    %c0_0 = arith.constant 0 : index
    %c0_1 = arith.constant 0 : index
    %c0_2 = arith.constant 0 : index
    %1 = vector.load %arg5[%c0, %c0_0, %c0_1, %c0_2] : memref<1x36x16x128xf32, #tpu.memory_space<vmem>>, vector<1x36x16x128xf32>
    tpu.vector_store %arg5[%c0, %c0_0, %c0_1, %c0_2], %0 {strides = array<i32>} : memref<1x36x16x128xf32, #tpu.memory_space<vmem>>, vector<1x36x16x128xf32>,
    %c0_3 = arith.constant 0 : index
    %c0_4 = arith.constant 0 : index
    %c0_5 = arith.constant 0 : index
    %2 = vector.load %arg1[%c0_3, %c0_4, %c0_5] : memref<1x64x16xbf16, #tpu.memory_space<vmem>>, vector<1x64x16xbf16>
    %3 = vector.shape_cast %2 : vector<1x64x16xbf16> to vector<64x16xbf16>
    %c0_6 = arith.constant 0 : index
    %c0_7 = arith.constant 0 : index
    %c0_8 = arith.constant 0 : index
    %4 = vector.load %arg2[%c0_6, %c0_7, %c0_8] : memref<9x16x128xbf16, #tpu.memory_space<vmem>>, vector<1x16x128xbf16>
    %5 = vector.shape_cast %4 : vector<1x16x128xbf16> to vector<16x128xbf16>
    %cst_9 = arith.constant dense<0.000000e+00> : vector<64x128xf32>
    %6 = tpu.matmul %3, %5, %cst_9 {dimension_numbers = #tpu.dot_dimension_numbers<[1], [0], [0], [1], [0, 0, 1, 1], [], []>} : vector<64x16xbf16>, vector<16x128xbf16>, vector<64x128xf32> -> vector<64x128xf32>
    %7 = vector.shape_cast %6 : vector<64x128xf32> to vector<8x8x128xf32>
    %c0_10 = arith.constant 0 : index
    %c0_11 = arith.constant 0 : index
    %c0_12 = arith.constant 0 : index
    %c0_13 = arith.constant 0 : index
    %8 = vector.load %arg5[%c0_10, %c0_11, %c0_12, %c0_13] : memref<1x36x16x128xf32, #tpu.memory_space<vmem>>, vector<1x8x8x128xf32>
    %9 = vector.shape_cast %8 : vector<1x8x8x128xf32> to vector<8x8x128xf32>
    %10 = arith.addf %9, %7 : vector<8x8x128xf32>
    %c0_14 = arith.constant 0 : index
    %c0_15 = arith.constant 0 : index
    %c0_16 = arith.constant 0 : index
    %c0_17 = arith.constant 0 : index
    %11 = vector.load %arg5[%c0_14, %c0_15, %c0_16, %c0_17] : memref<1x36x16x128xf32, #tpu.memory_space<vmem>>, vector<1x8x8x128xf32>
    %12 = vector.shape_cast %11 : vector<1x8x8x128xf32> to vector<8x8x128xf32>
    %13 = vector.shape_cast %10 : vector<8x8x128xf32> to vector<1x8x8x128xf32>
    tpu.vector_store %arg5[%c0_14, %c0_15, %c0_16, %c0_17], %13 {strides = array<i32>} : memref<1x36x16x128xf32, #tpu.memory_space<vmem>>, vector<1x8x8x128xf32>,
    %c1 = arith.constant 1 : index
    %c0_18 = arith.constant 0 : index
    %c0_19 = arith.constant 0 : index
    %14 = vector.load %arg2[%c1, %c0_18, %c0_19] : memref<9x16x128xbf16, #tpu.memory_space<vmem>>, vector<1x16x128xbf16>
    %15 = vector.shape_cast %14 : vector<1x16x128xbf16> to vector<16x128xbf16>
    %cst_20 = arith.constant dense<0.000000e+00> : vector<64x128xf32>
    %16 = tpu.matmul %3, %15, %cst_20 {dimension_numbers = #tpu.dot_dimension_numbers<[1], [0], [0], [1], [0, 0, 1, 1], [], []>} : vector<64x16xbf16>, vector<16x128xbf16>, vector<64x128xf32> -> vector<64x128xf32>
    %17 = vector.shape_cast %16 : vector<64x128xf32> to vector<8x8x128xf32>
    %c0_21 = arith.constant 0 : index
    %c9 = arith.constant 9 : index
    %c0_22 = arith.constant 0 : index
    %c0_23 = arith.constant 0 : index
    %18 = vector.load %arg5[%c0_21, %c9, %c0_22, %c0_23] : memref<1x36x16x128xf32, #tpu.memory_space<vmem>>, vector<1x8x8x128xf32>
    %19 = vector.shape_cast %18 : vector<1x8x8x128xf32> to vector<8x8x128xf32>
    %20 = arith.addf %19, %17 : vector<8x8x128xf32>
    %c0_24 = arith.constant 0 : index
    %c9_25 = arith.constant 9 : index
    %c0_26 = arith.constant 0 : index
    %c0_27 = arith.constant 0 : index
    %21 = vector.load %arg5[%c0_24, %c9_25, %c0_26, %c0_27] : memref<1x36x16x128xf32, #tpu.memory_space<vmem>>, vector<1x8x8x128xf32>
    %22 = vector.shape_cast %21 : vector<1x8x8x128xf32> to vector<8x8x128xf32>
    %23 = vector.shape_cast %20 : vector<8x8x128xf32> to vector<1x8x8x128xf32>
    tpu.vector_store %arg5[%c0_24, %c9_25, %c0_26, %c0_27], %23 {strides = array<i32>} : memref<1x36x16x128xf32, #tpu.memory_space<vmem>>, vector<1x8x8x128xf32>,
    %c2 = arith.constant 2 : index
    %c0_28 = arith.constant 0 : index
    %c0_29 = arith.constant 0 : index
    %24 = vector.load %arg2[%c2, %c0_28, %c0_29] : memref<9x16x128xbf16, #tpu.memory_space<vmem>>, vector<1x16x128xbf16>
    %25 = vector.shape_cast %24 : vector<1x16x128xbf16> to vector<16x128xbf16>
    %cst_30 = arith.constant dense<0.000000e+00> : vector<64x128xf32>
    %26 = tpu.matmul %3, %25, %cst_30 {dimension_numbers = #tpu.dot_dimension_numbers<[1], [0], [0], [1], [0, 0, 1, 1], [], []>} : vector<64x16xbf16>, vector<16x128xbf16>, vector<64x128xf32> -> vector<64x128xf32>
    %27 = vector.shape_cast %26 : vector<64x128xf32> to vector<8x8x128xf32>
    %c0_31 = arith.constant 0 : index
    %c0_32 = arith.constant 0 : index
    %c1_33 = arith.constant 1 : index
    %c0_34 = arith.constant 0 : index
    %28 = vector.load %arg5[%c0_31, %c0_32, %c1_33, %c0_34] : memref<1x36x16x128xf32, #tpu.memory_space<vmem>>, vector<1x8x8x128xf32>
    %29 = vector.shape_cast %28 : vector<1x8x8x128xf32> to vector<8x8x128xf32>
    %30 = arith.addf %29, %27 : vector<8x8x128xf32>
    %c0_35 = arith.constant 0 : index
    %c0_36 = arith.constant 0 : index
    %c1_37 = arith.constant 1 : index
    %c0_38 = arith.constant 0 : index
    %31 = vector.load %arg5[%c0_35, %c0_36, %c1_37, %c0_38] : memref<1x36x16x128xf32, #tpu.memory_space<vmem>>, vector<1x8x8x128xf32>
    %32 = vector.shape_cast %31 : vector<1x8x8x128xf32> to vector<8x8x128xf32>
    %33 = vector.shape_cast %30 : vector<8x8x128xf32> to vector<1x8x8x128xf32>
    tpu.vector_store %arg5[%c0_35, %c0_36, %c1_37, %c0_38], %33 {strides = array<i32>} : memref<1x36x16x128xf32, #tpu.memory_space<vmem>>, vector<1x8x8x128xf32>,
    %c3 = arith.constant 3 : index
    %c0_39 = arith.constant 0 : index
    %c0_40 = arith.constant 0 : index
    %34 = vector.load %arg2[%c3, %c0_39, %c0_40] : memref<9x16x128xbf16, #tpu.memory_space<vmem>>, vector<1x16x128xbf16>
    %35 = vector.shape_cast %34 : vector<1x16x128xbf16> to vector<16x128xbf16>
    %cst_41 = arith.constant dense<0.000000e+00> : vector<64x128xf32>
    %36 = tpu.matmul %3, %35, %cst_41 {dimension_numbers = #tpu.dot_dimension_numbers<[1], [0], [0], [1], [0, 0, 1, 1], [], []>} : vector<64x16xbf16>, vector<16x128xbf16>, vector<64x128xf32> -> vector<64x128xf32>
    %37 = vector.shape_cast %36 : vector<64x128xf32> to vector<8x8x128xf32>
    %c0_42 = arith.constant 0 : index
    %c18 = arith.constant 18 : index
    %c0_43 = arith.constant 0 : index
    %c0_44 = arith.constant 0 : index
    %38 = vector.load %arg5[%c0_42, %c18, %c0_43, %c0_44] : memref<1x36x16x128xf32, #tpu.memory_space<vmem>>, vector<1x8x8x128xf32>
    %39 = vector.shape_cast %38 : vector<1x8x8x128xf32> to vector<8x8x128xf32>
    %40 = arith.addf %39, %37 : vector<8x8x128xf32>
    %c0_45 = arith.constant 0 : index
    %c18_46 = arith.constant 18 : index
    %c0_47 = arith.constant 0 : index
    %c0_48 = arith.constant 0 : index
    %41 = vector.load %arg5[%c0_45, %c18_46, %c0_47, %c0_48] : memref<1x36x16x128xf32, #tpu.memory_space<vmem>>, vector<1x8x8x128xf32>
    %42 = vector.shape_cast %41 : vector<1x8x8x128xf32> to vector<8x8x128xf32>
    %43 = vector.shape_cast %40 : vector<8x8x128xf32> to vector<1x8x8x128xf32>
    tpu.vector_store %arg5[%c0_45, %c18_46, %c0_47, %c0_48], %43 {strides = array<i32>} : memref<1x36x16x128xf32, #tpu.memory_space<vmem>>, vector<1x8x8x128xf32>,
    %c4 = arith.constant 4 : index
    %c0_49 = arith.constant 0 : index
    %c0_50 = arith.constant 0 : index
    %44 = vector.load %arg2[%c4, %c0_49, %c0_50] : memref<9x16x128xbf16, #tpu.memory_space<vmem>>, vector<1x16x128xbf16>
    %45 = vector.shape_cast %44 : vector<1x16x128xbf16> to vector<16x128xbf16>
    %cst_51 = arith.constant dense<0.000000e+00> : vector<64x128xf32>
    %46 = tpu.matmul %3, %45, %cst_51 {dimension_numbers = #tpu.dot_dimension_numbers<[1], [0], [0], [1], [0, 0, 1, 1], [], []>} : vector<64x16xbf16>, vector<16x128xbf16>, vector<64x128xf32> -> vector<64x128xf32>
    %47 = vector.shape_cast %46 : vector<64x128xf32> to vector<8x8x128xf32>
    %c0_52 = arith.constant 0 : index
    %c27 = arith.constant 27 : index
    %c0_53 = arith.constant 0 : index
    %c0_54 = arith.constant 0 : index
    %48 = vector.load %arg5[%c0_52, %c27, %c0_53, %c0_54] : memref<1x36x16x128xf32, #tpu.memory_space<vmem>>, vector<1x8x8x128xf32>
    %49 = vector.shape_cast %48 : vector<1x8x8x128xf32> to vector<8x8x128xf32>
    %50 = arith.addf %49, %47 : vector<8x8x128xf32>
    %c0_55 = arith.constant 0 : index
    %c27_56 = arith.constant 27 : index
    %c0_57 = arith.constant 0 : index
    %c0_58 = arith.constant 0 : index
    %51 = vector.load %arg5[%c0_55, %c27_56, %c0_57, %c0_58] : memref<1x36x16x128xf32, #tpu.memory_space<vmem>>, vector<1x8x8x128xf32>
    %52 = vector.shape_cast %51 : vector<1x8x8x128xf32> to vector<8x8x128xf32>
    %53 = vector.shape_cast %50 : vector<8x8x128xf32> to vector<1x8x8x128xf32>
    tpu.vector_store %arg5[%c0_55, %c27_56, %c0_57, %c0_58], %53 {strides = array<i32>} : memref<1x36x16x128xf32, #tpu.memory_space<vmem>>, vector<1x8x8x128xf32>,
    %c5 = arith.constant 5 : index
    %c0_59 = arith.constant 0 : index
    %c0_60 = arith.constant 0 : index
    %54 = vector.load %arg2[%c5, %c0_59, %c0_60] : memref<9x16x128xbf16, #tpu.memory_space<vmem>>, vector<1x16x128xbf16>
    %55 = vector.shape_cast %54 : vector<1x16x128xbf16> to vector<16x128xbf16>
    %cst_61 = arith.constant dense<0.000000e+00> : vector<64x128xf32>
    %56 = tpu.matmul %3, %55, %cst_61 {dimension_numbers = #tpu.dot_dimension_numbers<[1], [0], [0], [1], [0, 0, 1, 1], [], []>} : vector<64x16xbf16>, vector<16x128xbf16>, vector<64x128xf32> -> vector<64x128xf32>
    %57 = vector.shape_cast %56 : vector<64x128xf32> to vector<8x8x128xf32>
    %c0_62 = arith.constant 0 : index
    %c18_63 = arith.constant 18 : index
    %c1_64 = arith.constant 1 : index
    %c0_65 = arith.constant 0 : index
    %58 = vector.load %arg5[%c0_62, %c18_63, %c1_64, %c0_65] : memref<1x36x16x128xf32, #tpu.memory_space<vmem>>, vector<1x8x8x128xf32>
    %59 = vector.shape_cast %58 : vector<1x8x8x128xf32> to vector<8x8x128xf32>
    %60 = arith.addf %59, %57 : vector<8x8x128xf32>
    %c0_66 = arith.constant 0 : index
    %c18_67 = arith.constant 18 : index
    %c1_68 = arith.constant 1 : index
    %c0_69 = arith.constant 0 : index
    %61 = vector.load %arg5[%c0_66, %c18_67, %c1_68, %c0_69] : memref<1x36x16x128xf32, #tpu.memory_space<vmem>>, vector<1x8x8x128xf32>
    %62 = vector.shape_cast %61 : vector<1x8x8x128xf32> to vector<8x8x128xf32>
    %63 = vector.shape_cast %60 : vector<8x8x128xf32> to vector<1x8x8x128xf32>
    tpu.vector_store %arg5[%c0_66, %c18_67, %c1_68, %c0_69], %63 {strides = array<i32>} : memref<1x36x16x128xf32, #tpu.memory_space<vmem>>, vector<1x8x8x128xf32>,
    %c6 = arith.constant 6 : index
    %c0_70 = arith.constant 0 : index
    %c0_71 = arith.constant 0 : index
    %64 = vector.load %arg2[%c6, %c0_70, %c0_71] : memref<9x16x128xbf16, #tpu.memory_space<vmem>>, vector<1x16x128xbf16>
    %65 = vector.shape_cast %64 : vector<1x16x128xbf16> to vector<16x128xbf16>
    %cst_72 = arith.constant dense<0.000000e+00> : vector<64x128xf32>
    %66 = tpu.matmul %3, %65, %cst_72 {dimension_numbers = #tpu.dot_dimension_numbers<[1], [0], [0], [1], [0, 0, 1, 1], [], []>} : vector<64x16xbf16>, vector<16x128xbf16>, vector<64x128xf32> -> vector<64x128xf32>
    %67 = vector.shape_cast %66 : vector<64x128xf32> to vector<8x8x128xf32>
    %c0_73 = arith.constant 0 : index
    %c1_74 = arith.constant 1 : index
    %c0_75 = arith.constant 0 : index
    %c0_76 = arith.constant 0 : index
    %68 = vector.load %arg5[%c0_73, %c1_74, %c0_75, %c0_76] : memref<1x36x16x128xf32, #tpu.memory_space<vmem>>, vector<1x8x8x128xf32>
    %69 = vector.shape_cast %68 : vector<1x8x8x128xf32> to vector<8x8x128xf32>
    %70 = arith.addf %69, %67 : vector<8x8x128xf32>
    %c0_77 = arith.constant 0 : index
    %c1_78 = arith.constant 1 : index
    %c0_79 = arith.constant 0 : index
    %c0_80 = arith.constant 0 : index
    %71 = vector.load %arg5[%c0_77, %c1_78, %c0_79, %c0_80] : memref<1x36x16x128xf32, #tpu.memory_space<vmem>>, vector<1x8x8x128xf32>
    %72 = vector.shape_cast %71 : vector<1x8x8x128xf32> to vector<8x8x128xf32>
    %73 = vector.shape_cast %70 : vector<8x8x128xf32> to vector<1x8x8x128xf32>
    tpu.vector_store %arg5[%c0_77, %c1_78, %c0_79, %c0_80], %73 {strides = array<i32>} : memref<1x36x16x128xf32, #tpu.memory_space<vmem>>, vector<1x8x8x128xf32>,
    %c7 = arith.constant 7 : index
    %c0_81 = arith.constant 0 : index
    %c0_82 = arith.constant 0 : index
    %74 = vector.load %arg2[%c7, %c0_81, %c0_82] : memref<9x16x128xbf16, #tpu.memory_space<vmem>>, vector<1x16x128xbf16>
    %75 = vector.shape_cast %74 : vector<1x16x128xbf16> to vector<16x128xbf16>
    %cst_83 = arith.constant dense<0.000000e+00> : vector<64x128xf32>
    %76 = tpu.matmul %3, %75, %cst_83 {dimension_numbers = #tpu.dot_dimension_numbers<[1], [0], [0], [1], [0, 0, 1, 1], [], []>} : vector<64x16xbf16>, vector<16x128xbf16>, vector<64x128xf32> -> vector<64x128xf32>
    %77 = vector.shape_cast %76 : vector<64x128xf32> to vector<8x8x128xf32>
    %c0_84 = arith.constant 0 : index
    %c10 = arith.constant 10 : index
    %c0_85 = arith.constant 0 : index
    %c0_86 = arith.constant 0 : index
    %78 = vector.load %arg5[%c0_84, %c10, %c0_85, %c0_86] : memref<1x36x16x128xf32, #tpu.memory_space<vmem>>, vector<1x8x8x128xf32>
    %79 = vector.shape_cast %78 : vector<1x8x8x128xf32> to vector<8x8x128xf32>
    %80 = arith.addf %79, %77 : vector<8x8x128xf32>
    %c0_87 = arith.constant 0 : index
    %c10_88 = arith.constant 10 : index
    %c0_89 = arith.constant 0 : index
    %c0_90 = arith.constant 0 : index
    %81 = vector.load %arg5[%c0_87, %c10_88, %c0_89, %c0_90] : memref<1x36x16x128xf32, #tpu.memory_space<vmem>>, vector<1x8x8x128xf32>
    %82 = vector.shape_cast %81 : vector<1x8x8x128xf32> to vector<8x8x128xf32>
    %83 = vector.shape_cast %80 : vector<8x8x128xf32> to vector<1x8x8x128xf32>
    tpu.vector_store %arg5[%c0_87, %c10_88, %c0_89, %c0_90], %83 {strides = array<i32>} : memref<1x36x16x128xf32, #tpu.memory_space<vmem>>, vector<1x8x8x128xf32>,
    %c8 = arith.constant 8 : index
    %c0_91 = arith.constant 0 : index
    %c0_92 = arith.constant 0 : index
    %84 = vector.load %arg2[%c8, %c0_91, %c0_92] : memref<9x16x128xbf16, #tpu.memory_space<vmem>>, vector<1x16x128xbf16>
    %85 = vector.shape_cast %84 : vector<1x16x128xbf16> to vector<16x128xbf16>
    %cst_93 = arith.constant dense<0.000000e+00> : vector<64x128xf32>
    %86 = tpu.matmul %3, %85, %cst_93 {dimension_numbers = #tpu.dot_dimension_numbers<[1], [0], [0], [1], [0, 0, 1, 1], [], []>} : vector<64x16xbf16>, vector<16x128xbf16>, vector<64x128xf32> -> vector<64x128xf32>
    %87 = vector.shape_cast %86 : vector<64x128xf32> to vector<8x8x128xf32>
    %c0_94 = arith.constant 0 : index
    %c1_95 = arith.constant 1 : index
    %c1_96 = arith.constant 1 : index
    %c0_97 = arith.constant 0 : index
    %88 = vector.load %arg5[%c0_94, %c1_95, %c1_96, %c0_97] : memref<1x36x16x128xf32, #tpu.memory_space<vmem>>, vector<1x8x8x128xf32>
    %89 = vector.shape_cast %88 : vector<1x8x8x128xf32> to vector<8x8x128xf32>
    %90 = arith.addf %89, %87 : vector<8x8x128xf32>
    %c0_98 = arith.constant 0 : index
    %c1_99 = arith.constant 1 : index
    %c1_100 = arith.constant 1 : index
    %c0_101 = arith.constant 0 : index
    %91 = vector.load %arg5[%c0_98, %c1_99, %c1_100, %c0_101] : memref<1x36x16x128xf32, #tpu.memory_space<vmem>>, vector<1x8x8x128xf32>
    %92 = vector.shape_cast %91 : vector<1x8x8x128xf32> to vector<8x8x128xf32>
    %93 = vector.shape_cast %90 : vector<8x8x128xf32> to vector<1x8x8x128xf32>
    tpu.vector_store %arg5[%c0_98, %c1_99, %c1_100, %c0_101], %93 {strides = array<i32>} : memref<1x36x16x128xf32, #tpu.memory_space<vmem>>, vector<1x8x8x128xf32>,
    %c0_102 = arith.constant 0 : index
    %c0_103 = arith.constant 0 : index
    %c0_104 = arith.constant 0 : index
    %c0_105 = arith.constant 0 : index
    %94 = vector.load %arg5[%c0_102, %c0_103, %c0_104, %c0_105] : memref<1x36x16x128xf32, #tpu.memory_space<vmem>>, vector<1x9x16x128xf32>
    %95 = vector.shape_cast %94 : vector<1x9x16x128xf32> to vector<9x16x128xf32>
    %c0_106 = arith.constant 0 : index
    %c0_107 = arith.constant 0 : index
    %c0_108 = arith.constant 0 : index
    %96 = vector.load %arg3[%c0_106, %c0_107, %c0_108] : memref<4x16x128xf32, #tpu.memory_space<vmem>>, vector<1x16x128xf32>
    %97 = vector.shape_cast %96 : vector<1x16x128xf32> to vector<16x128xf32>
    %98 = vector.shape_cast %97 : vector<16x128xf32> to vector<1x16x128xf32>
    %99 = vector.broadcast %98 : vector<1x16x128xf32> to vector<9x16x128xf32>
    %100 = arith.mulf %95, %99 : vector<9x16x128xf32>
    %c0_109 = arith.constant 0 : index
    %c0_110 = arith.constant 0 : index
    %c0_111 = arith.constant 0 : index
    %101 = vector.load %arg4[%c0_109, %c0_110, %c0_111] : memref<4x16x128xf32, #tpu.memory_space<vmem>>, vector<1x16x128xf32>
    %102 = vector.shape_cast %101 : vector<1x16x128xf32> to vector<16x128xf32>
    %103 = vector.shape_cast %102 : vector<16x128xf32> to vector<1x16x128xf32>
    %104 = vector.broadcast %103 : vector<1x16x128xf32> to vector<9x16x128xf32>
    %105 = arith.addf %100, %104 : vector<9x16x128xf32>
    %c0_112 = arith.constant 0 : index
    %c0_113 = arith.constant 0 : index
    %c0_114 = arith.constant 0 : index
    %c0_115 = arith.constant 0 : index
    %106 = vector.load %arg5[%c0_112, %c0_113, %c0_114, %c0_115] : memref<1x36x16x128xf32, #tpu.memory_space<vmem>>, vector<1x9x16x128xf32>
    %107 = vector.shape_cast %106 : vector<1x9x16x128xf32> to vector<9x16x128xf32>
    %108 = vector.shape_cast %105 : vector<9x16x128xf32> to vector<1x9x16x128xf32>
    tpu.vector_store %arg5[%c0_112, %c0_113, %c0_114, %c0_115], %108 {strides = array<i32>} : memref<1x36x16x128xf32, #tpu.memory_space<vmem>>, vector<1x9x16x128xf32>,
    %c0_116 = arith.constant 0 : index
    %c9_117 = arith.constant 9 : index
    %c0_118 = arith.constant 0 : index
    %c0_119 = arith.constant 0 : index
    %109 = vector.load %arg5[%c0_116, %c9_117, %c0_118, %c0_119] : memref<1x36x16x128xf32, #tpu.memory_space<vmem>>, vector<1x9x16x128xf32>
    %110 = vector.shape_cast %109 : vector<1x9x16x128xf32> to vector<9x16x128xf32>
    %c1_120 = arith.constant 1 : index
    %c0_121 = arith.constant 0 : index
    %c0_122 = arith.constant 0 : index
    %111 = vector.load %arg3[%c1_120, %c0_121, %c0_122] : memref<4x16x128xf32, #tpu.memory_space<vmem>>, vector<1x16x128xf32>
    %112 = vector.shape_cast %111 : vector<1x16x128xf32> to vector<16x128xf32>
    %113 = vector.shape_cast %112 : vector<16x128xf32> to vector<1x16x128xf32>
    %114 = vector.broadcast %113 : vector<1x16x128xf32> to vector<9x16x128xf32>
    %115 = arith.mulf %110, %114 : vector<9x16x128xf32>
    %c1_123 = arith.constant 1 : index
    %c0_124 = arith.constant 0 : index
    %c0_125 = arith.constant 0 : index
    %116 = vector.load %arg4[%c1_123, %c0_124, %c0_125] : memref<4x16x128xf32, #tpu.memory_space<vmem>>, vector<1x16x128xf32>
    %117 = vector.shape_cast %116 : vector<1x16x128xf32> to vector<16x128xf32>
    %118 = vector.shape_cast %117 : vector<16x128xf32> to vector<1x16x128xf32>
    %119 = vector.broadcast %118 : vector<1x16x128xf32> to vector<9x16x128xf32>
    %120 = arith.addf %115, %119 : vector<9x16x128xf32>
    %c0_126 = arith.constant 0 : index
    %c9_127 = arith.constant 9 : index
    %c0_128 = arith.constant 0 : index
    %c0_129 = arith.constant 0 : index
    %121 = vector.load %arg5[%c0_126, %c9_127, %c0_128, %c0_129] : memref<1x36x16x128xf32, #tpu.memory_space<vmem>>, vector<1x9x16x128xf32>
    %122 = vector.shape_cast %121 : vector<1x9x16x128xf32> to vector<9x16x128xf32>
    %123 = vector.shape_cast %120 : vector<9x16x128xf32> to vector<1x9x16x128xf32>
    tpu.vector_store %arg5[%c0_126, %c9_127, %c0_128, %c0_129], %123 {strides = array<i32>} : memref<1x36x16x128xf32, #tpu.memory_space<vmem>>, vector<1x9x16x128xf32>,
    %c0_130 = arith.constant 0 : index
    %c18_131 = arith.constant 18 : index
    %c0_132 = arith.constant 0 : index
    %c0_133 = arith.constant 0 : index
    %124 = vector.load %arg5[%c0_130, %c18_131, %c0_132, %c0_133] : memref<1x36x16x128xf32, #tpu.memory_space<vmem>>, vector<1x9x16x128xf32>
    %125 = vector.shape_cast %124 : vector<1x9x16x128xf32> to vector<9x16x128xf32>
    %c2_134 = arith.constant 2 : index
    %c0_135 = arith.constant 0 : index
    %c0_136 = arith.constant 0 : index
    %126 = vector.load %arg3[%c2_134, %c0_135, %c0_136] : memref<4x16x128xf32, #tpu.memory_space<vmem>>, vector<1x16x128xf32>
    %127 = vector.shape_cast %126 : vector<1x16x128xf32> to vector<16x128xf32>
    %128 = vector.shape_cast %127 : vector<16x128xf32> to vector<1x16x128xf32>
    %129 = vector.broadcast %128 : vector<1x16x128xf32> to vector<9x16x128xf32>
    %130 = arith.mulf %125, %129 : vector<9x16x128xf32>
    %c2_137 = arith.constant 2 : index
    %c0_138 = arith.constant 0 : index
    %c0_139 = arith.constant 0 : index
    %131 = vector.load %arg4[%c2_137, %c0_138, %c0_139] : memref<4x16x128xf32, #tpu.memory_space<vmem>>, vector<1x16x128xf32>
    %132 = vector.shape_cast %131 : vector<1x16x128xf32> to vector<16x128xf32>
    %133 = vector.shape_cast %132 : vector<16x128xf32> to vector<1x16x128xf32>
    %134 = vector.broadcast %133 : vector<1x16x128xf32> to vector<9x16x128xf32>
    %135 = arith.addf %130, %134 : vector<9x16x128xf32>
    %c0_140 = arith.constant 0 : index
    %c18_141 = arith.constant 18 : index
    %c0_142 = arith.constant 0 : index
    %c0_143 = arith.constant 0 : index
    %136 = vector.load %arg5[%c0_140, %c18_141, %c0_142, %c0_143] : memref<1x36x16x128xf32, #tpu.memory_space<vmem>>, vector<1x9x16x128xf32>
    %137 = vector.shape_cast %136 : vector<1x9x16x128xf32> to vector<9x16x128xf32>
    %138 = vector.shape_cast %135 : vector<9x16x128xf32> to vector<1x9x16x128xf32>
    tpu.vector_store %arg5[%c0_140, %c18_141, %c0_142, %c0_143], %138 {strides = array<i32>} : memref<1x36x16x128xf32, #tpu.memory_space<vmem>>, vector<1x9x16x128xf32>,
    %c0_144 = arith.constant 0 : index
    %c27_145 = arith.constant 27 : index
    %c0_146 = arith.constant 0 : index
    %c0_147 = arith.constant 0 : index
    %139 = vector.load %arg5[%c0_144, %c27_145, %c0_146, %c0_147] : memref<1x36x16x128xf32, #tpu.memory_space<vmem>>, vector<1x9x16x128xf32>
    %140 = vector.shape_cast %139 : vector<1x9x16x128xf32> to vector<9x16x128xf32>
    %c3_148 = arith.constant 3 : index
    %c0_149 = arith.constant 0 : index
    %c0_150 = arith.constant 0 : index
    %141 = vector.load %arg3[%c3_148, %c0_149, %c0_150] : memref<4x16x128xf32, #tpu.memory_space<vmem>>, vector<1x16x128xf32>
    %142 = vector.shape_cast %141 : vector<1x16x128xf32> to vector<16x128xf32>
    %143 = vector.shape_cast %142 : vector<16x128xf32> to vector<1x16x128xf32>
    %144 = vector.broadcast %143 : vector<1x16x128xf32> to vector<9x16x128xf32>
    %145 = arith.mulf %140, %144 : vector<9x16x128xf32>
    %c3_151 = arith.constant 3 : index
    %c0_152 = arith.constant 0 : index
    %c0_153 = arith.constant 0 : index
    %146 = vector.load %arg4[%c3_151, %c0_152, %c0_153] : memref<4x16x128xf32, #tpu.memory_space<vmem>>, vector<1x16x128xf32>
    %147 = vector.shape_cast %146 : vector<1x16x128xf32> to vector<16x128xf32>
    %148 = vector.shape_cast %147 : vector<16x128xf32> to vector<1x16x128xf32>
    %149 = vector.broadcast %148 : vector<1x16x128xf32> to vector<9x16x128xf32>
    %150 = arith.addf %145, %149 : vector<9x16x128xf32>
    %c0_154 = arith.constant 0 : index
    %c27_155 = arith.constant 27 : index
    %c0_156 = arith.constant 0 : index
    %c0_157 = arith.constant 0 : index
    %151 = vector.load %arg5[%c0_154, %c27_155, %c0_156, %c0_157] : memref<1x36x16x128xf32, #tpu.memory_space<vmem>>, vector<1x9x16x128xf32>
    %152 = vector.shape_cast %151 : vector<1x9x16x128xf32> to vector<9x16x128xf32>
    %153 = vector.shape_cast %150 : vector<9x16x128xf32> to vector<1x9x16x128xf32>
    tpu.vector_store %arg5[%c0_154, %c27_155, %c0_156, %c0_157], %153 {strides = array<i32>} : memref<1x36x16x128xf32, #tpu.memory_space<vmem>>, vector<1x9x16x128xf32>,
    return
  }
  func.func @transform_0(%arg0: i32) -> (i32, i32, i32) {
    %c0_i32 = arith.constant 0 : i32
    %c0_i32_0 = arith.constant 0 : i32
    %c0_i32_1 = arith.constant 0 : i32
    return %arg0, %c0_i32, %c0_i32_0 : i32, i32, i32
  }
  func.func @transform_1(%arg0: i32) -> (i32, i32, i32) {
    %c0_i32 = arith.constant 0 : i32
    %c0_i32_0 = arith.constant 0 : i32
    %c0_i32_1 = arith.constant 0 : i32
    %c0_i32_2 = arith.constant 0 : i32
    return %c0_i32, %c0_i32_0, %c0_i32_1 : i32, i32, i32
  }
  func.func @transform_2(%arg0: i32) -> (i32, i32, i32) {
    %c0_i32 = arith.constant 0 : i32
    %c0_i32_0 = arith.constant 0 : i32
    %c0_i32_1 = arith.constant 0 : i32
    %c0_i32_2 = arith.constant 0 : i32
    return %c0_i32, %c0_i32_0, %c0_i32_1 : i32, i32, i32
  }
  func.func @transform_3(%arg0: i32) -> (i32, i32, i32) {
    %c0_i32 = arith.constant 0 : i32
    %c0_i32_0 = arith.constant 0 : i32
    %c0_i32_1 = arith.constant 0 : i32
    %c0_i32_2 = arith.constant 0 : i32
    return %c0_i32, %c0_i32_0, %c0_i32_1 : i32, i32, i32
  }
  func.func @transform_4(%arg0: i32) -> (i32, i32, i32, i32) {
    %c0_i32 = arith.constant 0 : i32
    %c0_i32_0 = arith.constant 0 : i32
    %c0_i32_1 = arith.constant 0 : i32
    %c0_i32_2 = arith.constant 0 : i32
    return %arg0, %c0_i32, %c0_i32_0, %c0_i32_1 : i32, i32, i32, i32
  }
}

</mosaic_0001>

<bundles_post_ra>
// kernel: voice_conv_transpose2d.1
= control target key start
LH: loop header
LB: loop body
LE: loop exit
PB: predicated region body
PF: predicated region fallthrough
CT: control target
= control target key end

     0   :  { %s1646_s15 = smov 0   ;;  %s2157_s0 = inlined_call_operand.vmem [shape: bf16[2,64,16], index: 0, kind: input, shape index: {}]   ;;  %s2158_s1 = inlined_call_operand.vmem [shape: bf16[9,16,128], index: 1, kind: input, shape index: {}]   ;;  %s2159_s2 = inlined_call_operand.vmem [shape: f32[4,16,128], index: 2, kind: input, shape index: {}]   ;;  %s2160_s3 = inlined_call_operand.vmem [shape: f32[4,16,128], index: 3, kind: input, shape index: {}]   ;;  %s2161_s4 = inlined_call_operand.vmem [shape: f32[2,36,16,128], index: 4, kind: output, shape index: {}]  }
   0x1 LB: > { %s1239_s16 = sadd.s32 4294967295, %s1618_s15   ;;  %p1243_p0 = scmp.ge.s32.totalorder %s1618_s15, 1  ;;  %s1618_s15 = sphi %s1646_s15, %s14_s15  }
   0x2   : > { %p162_p1 = scmp.lt.s32.totalorder %s1618_s15, 3 }
   0x4   : > { %p163_p2 = pnand %p1243_p0, %p162_p1 }
   0x5   : > { %p188_p3 = scmp.lt.s32.totalorder (!%p163_p2), %s1239_s16, 1 }
   0x6   : > { %166 = sbr.rel (%p163_p2) target bundleno = 319 (0x13f), region = 36 }
   0xb   : > { %v1590_v0 = vld [vmem:[%s2158_s1] sm:$0xff]  ;;  %v1592_v1 = vld [vmem:[%s2158_s1 + $0x10] sm:$0xff]  ;;  %v1593_v2 = vld [vmem:[%s2158_s1 + $0x18] sm:$0xff]  ;;  %s2163_s16 = smov (!%p188_p3, %s1239_s16), 1  ;;  %vm307_vm0 = vcmask 130048   ;;  %v1620_v13 = vmov 0.0  }
   0xc   : > { %v1591_v3 = vld [vmem:[%s2158_s1 + $0x8] sm:$0xff]  ;;  %v1594_v4 = vld [vmem:[%s2158_s1 + $0x20] sm:$0xff]  ;;  %1599 = vmatpush.bf16.msra.mxu1 %v1590_v0  ;;  %1600 = vmatpush.bf16.msra.mxu2 %v1590_v0  ;;  %s1585_s27 = sshll.u32 %s2163_s16, 5  ;;  %v1596_v5 = vld [vmem:[%s2158_s1 + $0x30] sm:$0xff]  ;;  %s1602_s13 = smul.u32 576, %s2163_s16 }
   0xd   : > { %1601 = vmatpush.bf16.msra.mxu3 %v1590_v0  ;;  %327 = vmatpush.bf16.msra.mxu0 %v1590_v0  ;;  %s192_s30 = scalar_lea.vmem %s2157_s0, %s1585_s27  ;;  %v1597_v6 = vld [vmem:[%s2158_s1 + $0x38] sm:$0xff]  ;;  %v1595_v11 = vld [vmem:[%s2158_s1 + $0x28] sm:$0xff]  ;;  %v1598_v12 = vld [vmem:[%s2158_s1 + $0x40] sm:$0xff] }
   0xe   : > { %v1587_v7 = vld [vmem:[%s192_s30 + $0x8] sm:$0xff]  ;;  %v1588_v8 = vld [vmem:[%s192_s30 + $0x10] sm:$0xff]  ;;  %v1681_v9 = vld [vmem:[%s192_s30 + $0x18] sm:$0xff]  ;;  %s1720_s18 = scalar_lea.vmem %s2161_s4, %s1602_s13 }
   0xf   : > { %v1586_v10 = vld [vmem:[%s192_s30] sm:$0xff]  ;;  %1268 = vmatmul.msk.bf16.vlgmr.msra.gmra.mxu1 %vm307_vm0, %v1587_v7  ;;  %1269 = vmatmul.msk.bf16.vlgmr.msra.gmra.mxu2 %vm307_vm0, %v1588_v8  ;;  %200 = vst [vmem:[%s1720_s18 + $0x8] sm:$0xff] %v1620_v13  ;;  %v1762_v16 = vld [vmem:[%s2159_s2 + $0x30] sm:$0xff]  ;;  %v1808_v42 = vld [vmem:[%s2159_s2 + $0x8] sm:$0xff] }
  0x10   : > { %452 = vmatpush.bf16.msrb.mxu2 %v1592_v1  ;;  %389 = vmatpush.bf16.msrb.mxu1 %v1591_v3  ;;  %202 = vst [vmem:[%s1720_s18 + $0x18] sm:$0xff] %v1620_v13  ;;  %v1143_v18 = vmul.f32 0.0, %v1762_v16  ;;  %v1768_v21 = vld [vmem:[%s2160_s3 + $0x30] sm:$0xff]  ;;  %v1803_v41 = vld [vmem:[%s2159_s2] sm:$0xff]  ;;  %v1822_v51 = vld [vmem:[%s2160_s3 + $0x8] sm:$0xff] }
  0x11   : > { %514 = vmatpush.bf16.msrb.mxu3 %v1593_v2  ;;  %577 = vmatpush.bf16.msrb.mxu0 %v1594_v4  ;;  %204 = vst [vmem:[%s1720_s18 + $0x28] sm:$0xff] %v1620_v13  ;;  %v1779_v27 = vld [vmem:[%s2159_s2 + $0x10] sm:$0xff]  ;;  %v1815_v46 = vld [vmem:[%s2160_s3] sm:$0xff] }
  0x12   : > { %1270 = vmatmul.msk.bf16.vlgmr.msra.gmra.mxu3 %vm307_vm0, %v1681_v9  ;;  %1267 = vmatmul.msk.bf16.vlgmr.msra.gmra.mxu0 %vm307_vm0, %v1586_v10  ;;  %206 = vst [vmem:[%s1720_s18 + $0x38] sm:$0xff] %v1620_v13  ;;  %v1164_v23 = vadd.f32 %v1768_v21, %v1143_v18  ;;  %v1786_v29 = vld [vmem:[%s2160_s3 + $0x10] sm:$0xff] }
  0x13   : > { %208 = vst [vmem:[%s1720_s18 + $0x48] sm:$0xff] %v1620_v13 }
  0x14   : > { %702 = vmatpush.bf16.msra.mxu2 %v1596_v5  ;;  %640 = vmatpush.bf16.msra.mxu1 %v1595_v11  ;;  %210 = vst [vmem:[%s1720_s18 + $0x58] sm:$0xff] %v1620_v13 }
  0x15   : > { %765 = vmatpush.bf16.msra.mxu3 %v1597_v6  ;;  %828 = vmatpush.bf16.msra.mxu0 %v1598_v12  ;;  %212 = vst [vmem:[%s1720_s18 + $0x68] sm:$0xff] %v1620_v13 }
  0x16   : > { %214 = vst [vmem:[%s1720_s18 + $0x78] sm:$0xff] %v1620_v13 }
  0x17   : > { %216 = vst [vmem:[%s1720_s18 + $0x88] sm:$0xff] %v1620_v13 }
  0x18   : > { %236 = vst [vmem:[%s1720_s18 + $0x128] sm:$0xff] %v1620_v13 }
  0x19   : > { %238 = vst [vmem:[%s1720_s18 + $0x138] sm:$0xff] %v1620_v13 }
  0x1a   : > { %240 = vst [vmem:[%s1720_s18 + $0x148] sm:$0xff] %v1620_v13 }
  0x1b   : > { %242 = vst [vmem:[%s1720_s18 + $0x158] sm:$0xff] %v1620_v13 }
  0x1c   : > { %244 = vst [vmem:[%s1720_s18 + $0x168] sm:$0xff] %v1620_v13 }
  0x1d   : > { %246 = vst [vmem:[%s1720_s18 + $0x178] sm:$0xff] %v1620_v13 }
  0x1e   : > { %248 = vst [vmem:[%s1720_s18 + $0x188] sm:$0xff] %v1620_v13 }
  0x1f   : > { %1277 = vmatmul.msk.bf16.vlgmr.msrb.gmra.mxu1 %vm307_vm0, %v1586_v10  ;;  %1303 = vmatmul.msk.bf16.vlgmr.msrb.gmra.mxu2 %vm307_vm0, %v1586_v10  ;;  %250 = vst [vmem:[%s1720_s18 + $0x198] sm:$0xff] %v1620_v13 }
  0x20   : > { %1581 = vst [vmem:[%s1720_s18 + $0x230] sm:$0xff] %v1164_v23 }
  0x22   : > { %1313 = vmatmul.msk.bf16.vlgmr.msrb.gmra.mxu3 %vm307_vm0, %v1586_v10  ;;  %1339 = vmatmul.msk.bf16.vlgmr.msrb.gmra.mxu0 %vm307_vm0, %v1586_v10 }
  0x2f   : > { %1278 = vmatmul.msk.bf16.gmra.mxu1 %vm307_vm0, %v1587_v7  ;;  %1304 = vmatmul.msk.bf16.gmra.mxu2 %vm307_vm0, %v1587_v7 }
  0x32   : > { %1314 = vmatmul.msk.bf16.gmra.mxu3 %vm307_vm0, %v1587_v7  ;;  %1340 = vmatmul.msk.bf16.gmra.mxu0 %vm307_vm0, %v1587_v7 }
  0x3f   : > { %1279 = vmatmul.msk.bf16.gmra.mxu1 %vm307_vm0, %v1588_v8  ;;  %1305 = vmatmul.msk.bf16.gmra.mxu2 %vm307_vm0, %v1588_v8 }
  0x42   : > { %1315 = vmatmul.msk.bf16.gmra.mxu3 %vm307_vm0, %v1588_v8  ;;  %1341 = vmatmul.msk.bf16.gmra.mxu0 %vm307_vm0, %v1588_v8 }
  0x4f   : > { %1280 = vmatmul.msk.bf16.gmra.mxu1 %vm307_vm0, %v1681_v9  ;;  %1306 = vmatmul.msk.bf16.gmra.mxu2 %vm307_vm0, %v1681_v9 }
  0x52   : > { %1316 = vmatmul.msk.bf16.gmra.mxu3 %vm307_vm0, %v1681_v9  ;;  %1342 = vmatmul.msk.bf16.gmra.mxu0 %vm307_vm0, %v1681_v9 }
  0x5f   : > { %1365 = vmatmul.msk.bf16.vlgmr.msra.gmra.mxu1 %vm307_vm0, %v1586_v10  ;;  %1391 = vmatmul.msk.bf16.vlgmr.msra.gmra.mxu2 %vm307_vm0, %v1586_v10 }
  0x62   : > { %1417 = vmatmul.msk.bf16.vlgmr.msra.gmra.mxu3 %vm307_vm0, %v1586_v10  ;;  %1443 = vmatmul.msk.bf16.vlgmr.msra.gmra.mxu0 %vm307_vm0, %v1586_v10 }
  0x6f   : > { %1366 = vmatmul.msk.bf16.gmra.mxu1 %vm307_vm0, %v1587_v7  ;;  %1392 = vmatmul.msk.bf16.gmra.mxu2 %vm307_vm0, %v1587_v7 }
  0x72   : > { %1418 = vmatmul.msk.bf16.gmra.mxu3 %vm307_vm0, %v1587_v7  ;;  %1444 = vmatmul.msk.bf16.gmra.mxu0 %vm307_vm0, %v1587_v7 }
  0x7f   : > { %1367 = vmatmul.msk.bf16.gmra.mxu1 %vm307_vm0, %v1588_v8  ;;  %1393 = vmatmul.msk.bf16.gmra.mxu2 %vm307_vm0, %v1588_v8 }
  0x82   : > { %1419 = vmatmul.msk.bf16.gmra.mxu3 %vm307_vm0, %v1588_v8  ;;  %1445 = vmatmul.msk.bf16.gmra.mxu0 %vm307_vm0, %v1588_v8 }
  0x8c   : > { %v334_v14 = vpop.f32.mrf.mxu1 }
  0x8d   : > { %367 = vst [vmem:[%s1720_s18 + $0x20] sm:$0xff] %v334_v14 }
  0x8f   : > { %v329_v15 = vpop.f32.mrf.mxu0  ;;  %1368 = vmatmul.msk.bf16.gmra.mxu1 %vm307_vm0, %v1681_v9  ;;  %1394 = vmatmul.msk.bf16.gmra.mxu2 %vm307_vm0, %v1681_v9 }
  0x90   : > { %365 = vst [vmem:[%s1720_s18] sm:$0xff] %v329_v15 }
  0x92   : > { %1420 = vmatmul.msk.bf16.gmra.mxu3 %vm307_vm0, %v1681_v9  ;;  %1446 = vmatmul.msk.bf16.gmra.mxu0 %vm307_vm0, %v1681_v9  ;;  %v339_v17 = vpop.f32.mrf.mxu2 }
  0x93   : > { %369 = vst [vmem:[%s1720_s18 + $0x40] sm:$0xff] %v339_v17 }
  0x94   : > { %v336_v20 = vpop.f32.mrf.mxu1  ;;  %v476_v60 = vld [vmem:[%s1720_s18 + $0x21] sm:$0xff] }
  0x95   : > { %v344_v19 = vpop.f32.mrf.mxu3  ;;  %368 = vst [vmem:[%s1720_s18 + $0x30] sm:$0xff] %v336_v20  ;;  %v1867_v20 = vld [vmem:[%s2159_s2 + $0x28] sm:$0xff] }
  0x96   : > { %371 = vst [vmem:[%s1720_s18 + $0x60] sm:$0xff] %v344_v19  ;;  %v1862_v19 = vld [vmem:[%s2159_s2 + $0x20] sm:$0xff]  ;;  %v1066_v23 = vmul.f32 0.0, %v1867_v20 }
  0x97   : > { %v331_v22 = vpop.f32.mrf.mxu0  ;;  %v474_v31 = vld [vmem:[%s1720_s18 + $0x1] sm:$0xff] }
  0x98   : > { %366 = vst [vmem:[%s1720_s18 + $0x10] sm:$0xff] %v331_v22  ;;  %v1065_v22 = vmul.f32 0.0, %v1862_v19 }
  0x9a   : > { %v341_v24 = vpop.f32.mrf.mxu2  ;;  %v478_v12 = vld [vmem:[%s1720_s18 + $0x41] sm:$0xff] }
  0x9b   : > { %370 = vst [vmem:[%s1720_s18 + $0x50] sm:$0xff] %v341_v24 }
  0x9c   : > { %v391_v26 = vpop.f32.mrf.mxu1  ;;  %v477_v4 = vld [vmem:[%s1720_s18 + $0x31] sm:$0xff] }
  0x9d   : > { %v346_v25 = vpop.f32.mrf.mxu3  ;;  %v971_v30 = vmul.f32 %v1779_v27, %v391_v26 }
  0x9e   : > { %372 = vst [vmem:[%s1720_s18 + $0x70] sm:$0xff] %v346_v25  ;;  %v1875_v25 = vld [vmem:[%s2160_s3 + $0x20] sm:$0xff] }
  0x9f   : > { %v579_v28 = vpop.f32.mrf.mxu0  ;;  %v992_v33 = vadd.f32 %v1786_v29, %v971_v30  ;;  %v475_v44 = vld [vmem:[%s1720_s18 + $0x11] sm:$0xff]  ;;  %v1086_v26 = vadd.f32 %v1875_v25, %v1065_v22 }
  0xa0   : > { %v1127_v32 = vmul.f32 %v1762_v16, %v579_v28 }
  0xa1   : > { %1485 = vst [vmem:[%s1720_s18 + $0x90] sm:$0xff] %v992_v33 }
  0xa2   : > { %v454_v34 = vpop.f32.mrf.mxu2  ;;  %v1148_v35 = vadd.f32 %v1768_v21, %v1127_v32  ;;  %v479_v30 = vld [vmem:[%s1720_s18 + $0x51] sm:$0xff]  ;;  %v1883_v32 = vld [vmem:[%s2160_s3 + $0x28] sm:$0xff]  ;;  %1541 = vst [vmem:[%s1720_s18 + $0x1a0] sm:$0xff] %v1086_v26 }
  0xa3   : > { %v482_v36 = vadd.f32 %v474_v31, %v454_v34 }
  0xa4   : > { %v1794_v38 = vpop.f32.mrf.mxu1  ;;  %1565 = vst [vmem:[%s1720_s18 + $0x1b0] sm:$0xff] %v1148_v35  ;;  %v1087_v35 = vadd.f32 %v1883_v32, %v1066_v23 }
  0xa5   : > { %v516_v37 = vpop.f32.mrf.mxu3  ;;  %490 = vst [vmem:[%s1720_s18 + $0x1] sm:$0xff] %v482_v36 }
  0xa6   : > { %1325 = vst [vmem:[%s1720_s18 + $0x120] sm:$0xff] %v516_v37 }
  0xa7   : > { %v581_v39 = vpop.f32.mrf.mxu0  ;;  %1542 = vst [vmem:[%s1720_s18 + $0x1a8] sm:$0xff] %v1087_v35 }
  0xa8   : > { %v1129_v40 = vmul.f32 %v1762_v16, %v581_v39 }
  0xaa   : > { %v456_v43 = vpop.f32.mrf.mxu2  ;;  %v1150_v45 = vadd.f32 %v1768_v21, %v1129_v40 }
  0xab   : > { %v483_v47 = vadd.f32 %v475_v44, %v456_v43  ;;  %v480_v43 = vld [vmem:[%s1720_s18 + $0x61] sm:$0xff] }
  0xac   : > { %v874_v49 = vld [vmem:[%s1720_s18] sm:$0xff]  ;;  %v875_v50 = vld [vmem:[%s1720_s18 + $0x8] sm:$0xff]  ;;  %v1824_v52 = vpop.f32.mrf.mxu1  ;;  %1567 = vst [vmem:[%s1720_s18 + $0x1c0] sm:$0xff] %v1150_v45 }
  0xad   : > { %v518_v48 = vpop.f32.mrf.mxu3  ;;  %v894_v53 = vmul.f32 %v1803_v41, %v874_v49  ;;  %v895_v54 = vmul.f32 %v1808_v42, %v875_v50  ;;  %491 = vst [vmem:[%s1720_s18 + $0x11] sm:$0xff] %v483_v47 }
  0xae   : > { %1326 = vst [vmem:[%s1720_s18 + $0x130] sm:$0xff] %v518_v48 }
  0xaf   : > { %v584_v55 = vpop.f32.mrf.mxu0  ;;  %v914_v56 = vadd.f32 %v1815_v46, %v894_v53  ;;  %v915_v57 = vadd.f32 %v1822_v51, %v895_v54  ;;  %v481_v54 = vld [vmem:[%s1720_s18 + $0x71] sm:$0xff] }
  0xb0   : > { %v1131_v58 = vmul.f32 %v1762_v16, %v584_v55 }
  0xb1   : > { %932 = vst [vmem:[%s1720_s18] sm:$0xff] %v914_v56 }
  0xb2   : > { %933 = vst [vmem:[%s1720_s18 + $0x8] sm:$0xff] %v915_v57  ;;  %v459_v59 = vpop.f32.mrf.mxu2  ;;  %v1152_v61 = vadd.f32 %v1768_v21, %v1131_v58 }
  0xb3   : > { %v484_v62 = vadd.f32 %v476_v60, %v459_v59  ;;  %v1369_v59 = vld [vmem:[%s1720_s18 + $0x121] sm:$0xff] }
  0xb4   : > { %v1838_v0 = vpop.f32.mrf.mxu1  ;;  %1569 = vst [vmem:[%s1720_s18 + $0x1d0] sm:$0xff] %v1152_v61 }
  0xb5   : > { %v521_v63 = vpop.f32.mrf.mxu3  ;;  %492 = vst [vmem:[%s1720_s18 + $0x21] sm:$0xff] %v484_v62 }
  0xb6   : > { %1327 = vst [vmem:[%s1720_s18 + $0x140] sm:$0xff] %v521_v63 }
  0xb7   : > { %v586_v1 = vpop.f32.mrf.mxu0 }
  0xb8   : > { %v1133_v2 = vmul.f32 %v1762_v16, %v586_v1 }
  0xba   : > { %v461_v3 = vpop.f32.mrf.mxu2  ;;  %v1154_v5 = vadd.f32 %v1768_v21, %v1133_v2 }
  0xbb   : > { %v485_v6 = vadd.f32 %v477_v4, %v461_v3  ;;  %v1370_v3 = vld [vmem:[%s1720_s18 + $0x131] sm:$0xff] }
  0xbc   : > { %v1846_v8 = vpop.f32.mrf.mxu1  ;;  %1571 = vst [vmem:[%s1720_s18 + $0x1e0] sm:$0xff] %v1154_v5 }
  0xbd   : > { %v523_v7 = vpop.f32.mrf.mxu3  ;;  %493 = vst [vmem:[%s1720_s18 + $0x31] sm:$0xff] %v485_v6  ;;  %v1371_v26 = vld [vmem:[%s1720_s18 + $0x141] sm:$0xff] }
  0xbe   : > { %1328 = vst [vmem:[%s1720_s18 + $0x150] sm:$0xff] %v523_v7 }
  0xbf   : > { %v589_v9 = vpop.f32.mrf.mxu0 }
  0xc0   : > { %v1135_v10 = vmul.f32 %v1762_v16, %v589_v9 }
  0xc2   : > { %v464_v11 = vpop.f32.mrf.mxu2  ;;  %v1156_v13 = vadd.f32 %v1768_v21, %v1135_v10 }
  0xc3   : > { %v486_v14 = vadd.f32 %v478_v12, %v464_v11 }
  0xc4   : > { %v1854_v17 = vpop.f32.mrf.mxu1  ;;  %1573 = vst [vmem:[%s1720_s18 + $0x1f0] sm:$0xff] %v1156_v13 }
  0xc5   : > { %v526_v15 = vpop.f32.mrf.mxu3  ;;  %494 = vst [vmem:[%s1720_s18 + $0x41] sm:$0xff] %v486_v14  ;;  %v1396_v14 = vld [vmem:[%s1720_s18 + $0x20] sm:$0xff] }
  0xc6   : > { %1329 = vst [vmem:[%s1720_s18 + $0x160] sm:$0xff] %v526_v15 }
  0xc7   : > { %v591_v18 = vpop.f32.mrf.mxu0 }
  0xc8   : > { %v1137_v24 = vmul.f32 %v1762_v16, %v591_v18 }
  0xca   : > { %v466_v28 = vpop.f32.mrf.mxu2  ;;  %v1158_v31 = vadd.f32 %v1768_v21, %v1137_v24 }
  0xcb   : > { %v487_v33 = vadd.f32 %v479_v30, %v466_v28 }
  0xcc   : > { %v1887_v36 = vpop.f32.mrf.mxu1  ;;  %1575 = vst [vmem:[%s1720_s18 + $0x200] sm:$0xff] %v1158_v31 }
  0xcd   : > { %v528_v34 = vpop.f32.mrf.mxu3  ;;  %495 = vst [vmem:[%s1720_s18 + $0x51] sm:$0xff] %v487_v33 }
  0xce   : > { %1330 = vst [vmem:[%s1720_s18 + $0x170] sm:$0xff] %v528_v34 }
  0xcf   : > { %v594_v37 = vpop.f32.mrf.mxu0 }
  0xd0   : > { %v1139_v39 = vmul.f32 %v1762_v16, %v594_v37 }
  0xd2   : > { %v469_v40 = vpop.f32.mrf.mxu2  ;;  %v1160_v44 = vadd.f32 %v1768_v21, %v1139_v39 }
  0xd3   : > { %v488_v45 = vadd.f32 %v480_v43, %v469_v40 }
  0xd4   : > { %v1896_v48 = vpop.f32.mrf.mxu1  ;;  %1577 = vst [vmem:[%s1720_s18 + $0x210] sm:$0xff] %v1160_v44 }
  0xd5   : > { %v531_v47 = vpop.f32.mrf.mxu3  ;;  %496 = vst [vmem:[%s1720_s18 + $0x61] sm:$0xff] %v488_v45  ;;  %v1397_v45 = vld [vmem:[%s1720_s18 + $0x30] sm:$0xff] }
  0xd6   : > { %1331 = vst [vmem:[%s1720_s18 + $0x180] sm:$0xff] %v531_v47 }
  0xd7   : > { %v596_v49 = vpop.f32.mrf.mxu0 }
  0xd8   : > { %v1141_v50 = vmul.f32 %v1762_v16, %v596_v49  ;;  %v1395_v16 = vld [vmem:[%s1720_s18 + $0x10] sm:$0xff] }
  0xda   : > { %v471_v53 = vpop.f32.mrf.mxu2  ;;  %v1162_v55 = vadd.f32 %v1768_v21, %v1141_v50 }
  0xdb   : > { %v489_v56 = vadd.f32 %v481_v54, %v471_v53 }
  0xdc   : > { %1579 = vst [vmem:[%s1720_s18 + $0x220] sm:$0xff] %v1162_v55  ;;  %v642_v58 = vpop.f32.mrf.mxu1  ;;  %v1372_v55 = vld [vmem:[%s1720_s18 + $0x151] sm:$0xff] }
  0xdd   : > { %v533_v57 = vpop.f32.mrf.mxu3  ;;  %497 = vst [vmem:[%s1720_s18 + $0x71] sm:$0xff] %v489_v56  ;;  %v670_v60 = vadd.f32 %v1369_v59, %v642_v58 }
  0xde   : > { %1332 = vst [vmem:[%s1720_s18 + $0x190] sm:$0xff] %v533_v57 }
  0xdf   : > { %1377 = vst [vmem:[%s1720_s18 + $0x121] sm:$0xff] %v670_v60  ;;  %v830_v62 = vpop.f32.mrf.mxu0 }
  0xe2   : > { %v704_v61 = vpop.f32.mrf.mxu2 }
  0xe3   : > { %v733_v63 = vadd.f32 %v1395_v16, %v704_v61 }
  0xe4   : > { %v644_v2 = vpop.f32.mrf.mxu1 }
  0xe5   : > { %v767_v21 = vpop.f32.mrf.mxu3  ;;  %1403 = vst [vmem:[%s1720_s18 + $0x10] sm:$0xff] %v733_v63  ;;  %v671_v4 = vadd.f32 %v1370_v3, %v644_v2 }
  0xe6   : > { %v796_v1 = vadd.f32 %v767_v21, %v1794_v38  ;;  %v1503_v5 = vld [vmem:[%s1720_s18 + $0x120] sm:$0xff]  ;;  %v1504_v6 = vld [vmem:[%s1720_s18 + $0x128] sm:$0xff] }
  0xe7   : > { %v1049_v9 = vmul.f32 %v1862_v19, %v1503_v5  ;;  %v1050_v10 = vmul.f32 %v1867_v20, %v1504_v6  ;;  %1378 = vst [vmem:[%s1720_s18 + $0x131] sm:$0xff] %v671_v4  ;;  %v832_v28 = vpop.f32.mrf.mxu0 }
  0xe8   : > { %v973_v7 = vmul.f32 %v1779_v27, %v796_v1 }
  0xe9   : > { %v1070_v11 = vadd.f32 %v1875_v25, %v1049_v9  ;;  %v1071_v12 = vadd.f32 %v1883_v32, %v1050_v10  ;;  %v1398_v9 = vld [vmem:[%s1720_s18 + $0x40] sm:$0xff] }
  0xea   : > { %v994_v38 = vadd.f32 %v1786_v29, %v973_v7  ;;  %v706_v13 = vpop.f32.mrf.mxu2 }
  0xeb   : > { %1525 = vst [vmem:[%s1720_s18 + $0x120] sm:$0xff] %v1070_v11  ;;  %v734_v15 = vadd.f32 %v1396_v14, %v706_v13  ;;  %v1373_v14 = vld [vmem:[%s1720_s18 + $0x161] sm:$0xff] }
  0xec   : > { %1487 = vst [vmem:[%s1720_s18 + $0xa0] sm:$0xff] %v994_v38  ;;  %v1447_v22 = vld [vmem:[%s1720_s18 + $0x11] sm:$0xff]  ;;  %v647_v24 = vpop.f32.mrf.mxu1 }
  0xed   : > { %v769_v18 = vpop.f32.mrf.mxu3  ;;  %1526 = vst [vmem:[%s1720_s18 + $0x128] sm:$0xff] %v1071_v12  ;;  %v858_v30 = vadd.f32 %v1447_v22, %v830_v62  ;;  %v672_v31 = vadd.f32 %v1371_v26, %v647_v24 }
  0xee   : > { %v797_v23 = vadd.f32 %v769_v18, %v1824_v52  ;;  %1404 = vst [vmem:[%s1720_s18 + $0x20] sm:$0xff] %v734_v15  ;;  %v1505_v33 = vld [vmem:[%s1720_s18 + $0x130] sm:$0xff]  ;;  %v1506_v34 = vld [vmem:[%s1720_s18 + $0x138] sm:$0xff] }
  0xef   : > { %v1051_v37 = vmul.f32 %v1862_v19, %v1505_v33  ;;  %v1052_v39 = vmul.f32 %v1867_v20, %v1506_v34  ;;  %1455 = vst [vmem:[%s1720_s18 + $0x11] sm:$0xff] %v858_v30  ;;  %v835_v61 = vpop.f32.mrf.mxu0 }
  0xf0   : > { %v975_v35 = vmul.f32 %v1779_v27, %v797_v23  ;;  %1379 = vst [vmem:[%s1720_s18 + $0x141] sm:$0xff] %v672_v31 }
  0xf1   : > { %v1072_v40 = vadd.f32 %v1875_v25, %v1051_v37  ;;  %v1073_v43 = vadd.f32 %v1883_v32, %v1052_v39 }
  0xf2   : > { %v996_v52 = vadd.f32 %v1786_v29, %v975_v35  ;;  %v709_v44 = vpop.f32.mrf.mxu2 }
  0xf3   : > { %1527 = vst [vmem:[%s1720_s18 + $0x130] sm:$0xff] %v1072_v40  ;;  %v735_v47 = vadd.f32 %v1397_v45, %v709_v44  ;;  %v1399_v44 = vld [vmem:[%s1720_s18 + $0x50] sm:$0xff] }
  0xf4   : > { %1489 = vst [vmem:[%s1720_s18 + $0xb0] sm:$0xff] %v996_v52  ;;  %v649_v54 = vpop.f32.mrf.mxu1 }
  0xf5   : > { %v772_v49 = vpop.f32.mrf.mxu3  ;;  %1528 = vst [vmem:[%s1720_s18 + $0x138] sm:$0xff] %v1073_v43  ;;  %v1448_v50 = vld [vmem:[%s1720_s18 + $0x21] sm:$0xff]  ;;  %v673_v57 = vadd.f32 %v1372_v55, %v649_v54 }
  0xf6   : > { %v798_v53 = vadd.f32 %v772_v49, %v1838_v0  ;;  %v859_v56 = vadd.f32 %v1448_v50, %v832_v28  ;;  %1405 = vst [vmem:[%s1720_s18 + $0x30] sm:$0xff] %v735_v47  ;;  %v876_v58 = vld [vmem:[%s1720_s18 + $0x10] sm:$0xff]  ;;  %v877_v59 = vld [vmem:[%s1720_s18 + $0x18] sm:$0xff] }
  0xf7   : > { %v896_v16 = vmul.f32 %v1803_v41, %v876_v58  ;;  %v897_v62 = vmul.f32 %v1808_v42, %v877_v59  ;;  %v1507_v63 = vld [vmem:[%s1720_s18 + $0x140] sm:$0xff]  ;;  %v1508_v0 = vld [vmem:[%s1720_s18 + $0x148] sm:$0xff]  ;;  %1380 = vst [vmem:[%s1720_s18 + $0x151] sm:$0xff] %v673_v57  ;;  %v837_v35 = vpop.f32.mrf.mxu0 }
  0xf8   : > { %v977_v60 = vmul.f32 %v1779_v27, %v798_v53  ;;  %1456 = vst [vmem:[%s1720_s18 + $0x21] sm:$0xff] %v859_v56  ;;  %v1053_v21 = vmul.f32 %v1862_v19, %v1507_v63  ;;  %v1054_v1 = vmul.f32 %v1867_v20, %v1508_v0  ;;  %v1374_v53 = vld [vmem:[%s1720_s18 + $0x171] sm:$0xff] }
  0xf9   : > { %v916_v3 = vadd.f32 %v1815_v46, %v896_v16  ;;  %v917_v4 = vadd.f32 %v1822_v51, %v897_v62 }
  0xfa   : > { %v998_v2 = vadd.f32 %v1786_v29, %v977_v60  ;;  %v1074_v5 = vadd.f32 %v1875_v25, %v1053_v21  ;;  %v1075_v6 = vadd.f32 %v1883_v32, %v1054_v1  ;;  %v711_v7 = vpop.f32.mrf.mxu2 }
  0xfb   : > { %934 = vst [vmem:[%s1720_s18 + $0x10] sm:$0xff] %v916_v3  ;;  %v736_v11 = vadd.f32 %v1398_v9, %v711_v7 }
  0xfc   : > { %1491 = vst [vmem:[%s1720_s18 + $0xc0] sm:$0xff] %v998_v2  ;;  %v652_v13 = vpop.f32.mrf.mxu1 }
  0xfd   : > { %v774_v10 = vpop.f32.mrf.mxu3  ;;  %935 = vst [vmem:[%s1720_s18 + $0x18] sm:$0xff] %v917_v4  ;;  %v1449_v38 = vld [vmem:[%s1720_s18 + $0x31] sm:$0xff]  ;;  %v674_v18 = vadd.f32 %v1373_v14, %v652_v13  ;;  %v1375_v13 = vld [vmem:[%s1720_s18 + $0x181] sm:$0xff] }
  0xfe   : > { %v799_v12 = vadd.f32 %v774_v10, %v1846_v8  ;;  %1529 = vst [vmem:[%s1720_s18 + $0x140] sm:$0xff] %v1074_v5  ;;  %v860_v15 = vadd.f32 %v1449_v38, %v835_v61  ;;  %v1509_v30 = vld [vmem:[%s1720_s18 + $0x150] sm:$0xff]  ;;  %v1510_v8 = vld [vmem:[%s1720_s18 + $0x158] sm:$0xff] }
  0xff   : > { %1530 = vst [vmem:[%s1720_s18 + $0x148] sm:$0xff] %v1075_v6  ;;  %v878_v22 = vld [vmem:[%s1720_s18 + $0x20] sm:$0xff]  ;;  %v879_v23 = vld [vmem:[%s1720_s18 + $0x28] sm:$0xff]  ;;  %v1055_v31 = vmul.f32 %v1862_v19, %v1509_v30  ;;  %v1056_v33 = vmul.f32 %v1867_v20, %v1510_v8  ;;  %v840_v1 = vpop.f32.mrf.mxu0 }
 0x100   : > { %v979_v24 = vmul.f32 %v1779_v27, %v799_v12  ;;  %v898_v26 = vmul.f32 %v1803_v41, %v878_v22  ;;  %v899_v28 = vmul.f32 %v1808_v42, %v879_v23  ;;  %1457 = vst [vmem:[%s1720_s18 + $0x31] sm:$0xff] %v860_v15  ;;  %v1400_v6 = vld [vmem:[%s1720_s18 + $0x60] sm:$0xff] }
 0x101   : > { %1406 = vst [vmem:[%s1720_s18 + $0x40] sm:$0xff] %v736_v11  ;;  %v1076_v52 = vadd.f32 %v1875_v25, %v1055_v31  ;;  %v1077_v40 = vadd.f32 %v1883_v32, %v1056_v33 }
 0x102   : > { %v1000_v34 = vadd.f32 %v1786_v29, %v979_v24  ;;  %v918_v37 = vadd.f32 %v1815_v46, %v898_v26  ;;  %v919_v39 = vadd.f32 %v1822_v51, %v899_v28  ;;  %1381 = vst [vmem:[%s1720_s18 + $0x161] sm:$0xff] %v674_v18  ;;  %v714_v43 = vpop.f32.mrf.mxu2 }
 0x103   : > { %v737_v45 = vadd.f32 %v1399_v44, %v714_v43  ;;  %1531 = vst [vmem:[%s1720_s18 + $0x150] sm:$0xff] %v1076_v52 }
 0x104   : > { %1493 = vst [vmem:[%s1720_s18 + $0xd0] sm:$0xff] %v1000_v34  ;;  %v654_v50 = vpop.f32.mrf.mxu1 }
 0x105   : > { %936 = vst [vmem:[%s1720_s18 + $0x20] sm:$0xff] %v918_v37  ;;  %v777_v47 = vpop.f32.mrf.mxu3  ;;  %v675_v54 = vadd.f32 %v1374_v53, %v654_v50 }
 0x106   : > { %937 = vst [vmem:[%s1720_s18 + $0x28] sm:$0xff] %v919_v39  ;;  %v800_v49 = vadd.f32 %v777_v47, %v1854_v17  ;;  %v1376_v47 = vld [vmem:[%s1720_s18 + $0x191] sm:$0xff] }
 0x107   : > { %1532 = vst [vmem:[%s1720_s18 + $0x158] sm:$0xff] %v1077_v40  ;;  %v880_v55 = vld [vmem:[%s1720_s18 + $0x30] sm:$0xff]  ;;  %v881_v56 = vld [vmem:[%s1720_s18 + $0x38] sm:$0xff]  ;;  %v842_v40 = vpop.f32.mrf.mxu0 }
 0x108   : > { %v900_v57 = vmul.f32 %v1803_v41, %v880_v55  ;;  %v901_v58 = vmul.f32 %v1808_v42, %v881_v56  ;;  %v1450_v59 = vld [vmem:[%s1720_s18 + $0x41] sm:$0xff]  ;;  %1407 = vst [vmem:[%s1720_s18 + $0x50] sm:$0xff] %v737_v45  ;;  %v981_v60 = vmul.f32 %v1779_v27, %v800_v49  ;;  %v1482_v49 = vld [vmem:[%s2159_s2 + $0x18] sm:$0xff] }
 0x109   : > { %v1511_v17 = vld [vmem:[%s1720_s18 + $0x160] sm:$0xff]  ;;  %v1512_v61 = vld [vmem:[%s1720_s18 + $0x168] sm:$0xff]  ;;  %v861_v16 = vadd.f32 %v1450_v59, %v837_v35  ;;  %1382 = vst [vmem:[%s1720_s18 + $0x171] sm:$0xff] %v675_v54  ;;  %v1401_v35 = vld [vmem:[%s1720_s18 + $0x70] sm:$0xff]  ;;  %v972_v53 = vmul.f32 0.0, %v1482_v49 }
 0x10a   : > { %v920_v62 = vadd.f32 %v1815_v46, %v900_v57  ;;  %v921_v63 = vadd.f32 %v1822_v51, %v901_v58  ;;  %v1057_v0 = vmul.f32 %v1862_v19, %v1511_v17  ;;  %v1058_v21 = vmul.f32 %v1867_v20, %v1512_v61  ;;  %v716_v2 = vpop.f32.mrf.mxu2 }
 0x10b   : > { %1458 = vst [vmem:[%s1720_s18 + $0x41] sm:$0xff] %v861_v16  ;;  %v1002_v5 = vadd.f32 %v1786_v29, %v981_v60  ;;  %v738_v9 = vadd.f32 %v1400_v6, %v716_v2 }
 0x10c   : > { %938 = vst [vmem:[%s1720_s18 + $0x30] sm:$0xff] %v920_v62  ;;  %v1078_v3 = vadd.f32 %v1875_v25, %v1057_v0  ;;  %v1079_v4 = vadd.f32 %v1883_v32, %v1058_v21  ;;  %v657_v38 = vpop.f32.mrf.mxu1 }
 0x10d   : > { %v779_v7 = vpop.f32.mrf.mxu3  ;;  %939 = vst [vmem:[%s1720_s18 + $0x38] sm:$0xff] %v921_v63  ;;  %v676_v22 = vadd.f32 %v1375_v13, %v657_v38 }
 0x10e   : > { %v801_v10 = vadd.f32 %v779_v7, %v1887_v36  ;;  %1533 = vst [vmem:[%s1720_s18 + $0x160] sm:$0xff] %v1078_v3 }
 0x10f   : > { %1534 = vst [vmem:[%s1720_s18 + $0x168] sm:$0xff] %v1079_v4  ;;  %v1451_v11 = vld [vmem:[%s1720_s18 + $0x51] sm:$0xff]  ;;  %v845_v6 = vpop.f32.mrf.mxu0 }
 0x110   : > { %v983_v12 = vmul.f32 %v1779_v27, %v801_v10  ;;  %1495 = vst [vmem:[%s1720_s18 + $0xe0] sm:$0xff] %v1002_v5  ;;  %v1513_v14 = vld [vmem:[%s1720_s18 + $0x170] sm:$0xff]  ;;  %v1514_v15 = vld [vmem:[%s1720_s18 + $0x178] sm:$0xff]  ;;  %v862_v18 = vadd.f32 %v1451_v11, %v840_v1 }
 0x111   : > { %v1059_v36 = vmul.f32 %v1862_v19, %v1513_v14  ;;  %v1060_v23 = vmul.f32 %v1867_v20, %v1514_v15  ;;  %1408 = vst [vmem:[%s1720_s18 + $0x60] sm:$0xff] %v738_v9 }
 0x112   : > { %v1004_v24 = vadd.f32 %v1786_v29, %v983_v12  ;;  %v882_v26 = vld [vmem:[%s1720_s18 + $0x40] sm:$0xff]  ;;  %v883_v28 = vld [vmem:[%s1720_s18 + $0x48] sm:$0xff]  ;;  %1459 = vst [vmem:[%s1720_s18 + $0x51] sm:$0xff] %v862_v18  ;;  %v719_v34 = vpop.f32.mrf.mxu2 }
 0x113   : > { %v902_v30 = vmul.f32 %v1803_v41, %v882_v26  ;;  %v903_v8 = vmul.f32 %v1808_v42, %v883_v28  ;;  %v1080_v31 = vadd.f32 %v1875_v25, %v1059_v36  ;;  %v1081_v33 = vadd.f32 %v1883_v32, %v1060_v23  ;;  %1383 = vst [vmem:[%s1720_s18 + $0x181] sm:$0xff] %v676_v22 }
 0x114   : > { %1497 = vst [vmem:[%s1720_s18 + $0xf0] sm:$0xff] %v1004_v24  ;;  %v739_v43 = vadd.f32 %v1401_v35, %v719_v34  ;;  %v659_v45 = vpop.f32.mrf.mxu1  ;;  %v1562_v24 = vld [vmem:[%s2159_s2 + $0x38] sm:$0xff] }
 0x115   : > { %v782_v37 = vpop.f32.mrf.mxu3  ;;  %v922_v39 = vadd.f32 %v1815_v46, %v902_v30  ;;  %v923_v52 = vadd.f32 %v1822_v51, %v903_v8  ;;  %1535 = vst [vmem:[%s1720_s18 + $0x170] sm:$0xff] %v1080_v31  ;;  %v677_v50 = vadd.f32 %v1376_v47, %v659_v45  ;;  %v1128_v31 = vmul.f32 0.0, %v1562_v24  ;;  %v1564_v35 = vld [vmem:[%s2160_s3 + $0x38] sm:$0xff] }
 0x116   : > { %v802_v44 = vadd.f32 %v782_v37, %v1896_v48  ;;  %1536 = vst [vmem:[%s1720_s18 + $0x178] sm:$0xff] %v1081_v33  ;;  %v1484_v48 = vld [vmem:[%s2160_s3 + $0x18] sm:$0xff] }
 0x117   : > { %940 = vst [vmem:[%s1720_s18 + $0x40] sm:$0xff] %v922_v39  ;;  %v2062_v60 = vadd.f32 %v1484_v48, %v972_v53  ;;  %v1149_v37 = vadd.f32 %v1564_v35, %v1128_v31 }
 0x118   : > { %v985_v54 = vmul.f32 %v1779_v27, %v802_v44  ;;  %941 = vst [vmem:[%s1720_s18 + $0x48] sm:$0xff] %v923_v52  ;;  %v1452_v55 = vld [vmem:[%s1720_s18 + $0x61] sm:$0xff] }
 0x119   : > { %v884_v56 = vld [vmem:[%s1720_s18 + $0x50] sm:$0xff]  ;;  %v885_v57 = vld [vmem:[%s1720_s18 + $0x58] sm:$0xff]  ;;  %v863_v58 = vadd.f32 %v1452_v55, %v842_v40  ;;  %1409 = vst [vmem:[%s1720_s18 + $0x70] sm:$0xff] %v739_v43 }
 0x11a   : > { %v1006_v59 = vadd.f32 %v1786_v29, %v985_v54  ;;  %v904_v17 = vmul.f32 %v1803_v41, %v884_v56  ;;  %v905_v61 = vmul.f32 %v1808_v42, %v885_v57  ;;  %1384 = vst [vmem:[%s1720_s18 + $0x191] sm:$0xff] %v677_v50  ;;  %v1515_v16 = vld [vmem:[%s1720_s18 + $0x180] sm:$0xff]  ;;  %v1516_v62 = vld [vmem:[%s1720_s18 + $0x188] sm:$0xff]  ;;  %v721_v63 = vpop.f32.mrf.mxu2 }
 0x11b   : > { %1460 = vst [vmem:[%s1720_s18 + $0x61] sm:$0xff] %v863_v58  ;;  %v1061_v1 = vmul.f32 %v1862_v19, %v1515_v16  ;;  %v1062_v2 = vmul.f32 %v1867_v20, %v1516_v62 }
 0x11c   : > { %v924_v0 = vadd.f32 %v1815_v46, %v904_v17  ;;  %v925_v21 = vadd.f32 %v1822_v51, %v905_v61  ;;  %1499 = vst [vmem:[%s1720_s18 + $0x100] sm:$0xff] %v1006_v59 }
 0x11d   : > { %v784_v3 = vpop.f32.mrf.mxu3  ;;  %1486 = vst [vmem:[%s1720_s18 + $0x98] sm:$0xff] %v2062_v60  ;;  %v1082_v4 = vadd.f32 %v1875_v25, %v1061_v1  ;;  %v1083_v5 = vadd.f32 %v1883_v32, %v1062_v2 }
 0x11e   : > { %942 = vst [vmem:[%s1720_s18 + $0x50] sm:$0xff] %v924_v0  ;;  %v987_v7 = vmul.f32 %v1779_v27, %v784_v3 }
 0x11f   : > { %943 = vst [vmem:[%s1720_s18 + $0x58] sm:$0xff] %v925_v21 }
 0x120   : > { %1537 = vst [vmem:[%s1720_s18 + $0x180] sm:$0xff] %v1082_v4  ;;  %v1453_v9 = vld [vmem:[%s1720_s18 + $0x71] sm:$0xff]  ;;  %v1008_v12 = vadd.f32 %v1786_v29, %v987_v7 }
 0x121   : > { %1538 = vst [vmem:[%s1720_s18 + $0x188] sm:$0xff] %v1083_v5  ;;  %v1517_v10 = vld [vmem:[%s1720_s18 + $0x190] sm:$0xff]  ;;  %v1518_v38 = vld [vmem:[%s1720_s18 + $0x198] sm:$0xff]  ;;  %v864_v11 = vadd.f32 %v1453_v9, %v845_v6 }
 0x122   : > { %v886_v13 = vld [vmem:[%s1720_s18 + $0x60] sm:$0xff]  ;;  %v887_v14 = vld [vmem:[%s1720_s18 + $0x68] sm:$0xff]  ;;  %v1063_v15 = vmul.f32 %v1862_v19, %v1517_v10  ;;  %v1064_v27 = vmul.f32 %v1867_v20, %v1518_v38  ;;  %1410 = vst [vmem:[%s1720_s18 + $0x80] sm:$0xff] %v721_v63  ;;  %v847_v20 = vpop.f32.mrf.mxu0 }
 0x123   : > { %v906_v18 = vmul.f32 %v1803_v41, %v886_v13  ;;  %v907_v22 = vmul.f32 %v1808_v42, %v887_v14  ;;  %1461 = vst [vmem:[%s1720_s18 + $0x71] sm:$0xff] %v864_v11 }
 0x124   : > { %v1084_v29 = vadd.f32 %v1875_v25, %v1063_v15  ;;  %1501 = vst [vmem:[%s1720_s18 + $0x110] sm:$0xff] %v1008_v12  ;;  %v1085_v19 = vadd.f32 %v1883_v32, %v1064_v27 }
 0x125   : > { %v926_v36 = vadd.f32 %v1815_v46, %v906_v18  ;;  %v927_v23 = vadd.f32 %v1822_v51, %v907_v22  ;;  %1488 = vst [vmem:[%s1720_s18 + $0xa8] sm:$0xff] %v2062_v60 }
 0x126   : > { %1539 = vst [vmem:[%s1720_s18 + $0x190] sm:$0xff] %v1084_v29 }
 0x127   : > { %944 = vst [vmem:[%s1720_s18 + $0x60] sm:$0xff] %v926_v36 }
 0x128   : > { %945 = vst [vmem:[%s1720_s18 + $0x68] sm:$0xff] %v927_v23 }
 0x129   : > { %1540 = vst [vmem:[%s1720_s18 + $0x198] sm:$0xff] %v1085_v19  ;;  %v1454_v25 = vld [vmem:[%s1720_s18 + $0x81] sm:$0xff] }
 0x12a   : > { %v888_v26 = vld [vmem:[%s1720_s18 + $0x70] sm:$0xff]  ;;  %v889_v28 = vld [vmem:[%s1720_s18 + $0x78] sm:$0xff]  ;;  %v865_v32 = vadd.f32 %v1454_v25, %v847_v20  ;;  %1490 = vst [vmem:[%s1720_s18 + $0xb8] sm:$0xff] %v2062_v60 }
 0x12b   : > { %v908_v30 = vmul.f32 %v1803_v41, %v888_v26  ;;  %v909_v8 = vmul.f32 %v1808_v42, %v889_v28  ;;  %1492 = vst [vmem:[%s1720_s18 + $0xc8] sm:$0xff] %v2062_v60 }
 0x12c   : > { %1462 = vst [vmem:[%s1720_s18 + $0x81] sm:$0xff] %v865_v32 }
 0x12d   : > { %v928_v33 = vadd.f32 %v1815_v46, %v908_v30  ;;  %v929_v34 = vadd.f32 %v1822_v51, %v909_v8  ;;  %1494 = vst [vmem:[%s1720_s18 + $0xd8] sm:$0xff] %v2062_v60 }
 0x12e   : > { %1496 = vst [vmem:[%s1720_s18 + $0xe8] sm:$0xff] %v2062_v60 }
 0x12f   : > { %946 = vst [vmem:[%s1720_s18 + $0x70] sm:$0xff] %v928_v33 }
 0x130   : > { %947 = vst [vmem:[%s1720_s18 + $0x78] sm:$0xff] %v929_v34 }
 0x131   : > { %1498 = vst [vmem:[%s1720_s18 + $0xf8] sm:$0xff] %v2062_v60 }
 0x132   : > { %1500 = vst [vmem:[%s1720_s18 + $0x108] sm:$0xff] %v2062_v60 }
 0x133   : > { %v890_v39 = vld [vmem:[%s1720_s18 + $0x80] sm:$0xff]  ;;  %v891_v52 = vld [vmem:[%s1720_s18 + $0x88] sm:$0xff]  ;;  %1502 = vst [vmem:[%s1720_s18 + $0x118] sm:$0xff] %v2062_v60 }
 0x134   : > { %v910_v40 = vmul.f32 %v1803_v41, %v890_v39  ;;  %v911_v43 = vmul.f32 %v1808_v42, %v891_v52  ;;  %1566 = vst [vmem:[%s1720_s18 + $0x1b8] sm:$0xff] %v1149_v37 }
 0x135   : > { %1568 = vst [vmem:[%s1720_s18 + $0x1c8] sm:$0xff] %v1149_v37 }
 0x136   : > { %v930_v44 = vadd.f32 %v1815_v46, %v910_v40  ;;  %v931_v45 = vadd.f32 %v1822_v51, %v911_v43  ;;  %1570 = vst [vmem:[%s1720_s18 + $0x1d8] sm:$0xff] %v1149_v37 }
 0x137   : > { %1572 = vst [vmem:[%s1720_s18 + $0x1e8] sm:$0xff] %v1149_v37 }
 0x138   : > { %948 = vst [vmem:[%s1720_s18 + $0x80] sm:$0xff] %v930_v44 }
 0x139   : > { %949 = vst [vmem:[%s1720_s18 + $0x88] sm:$0xff] %v931_v45 }
 0x13a   : > { %1574 = vst [vmem:[%s1720_s18 + $0x1f8] sm:$0xff] %v1149_v37 }
 0x13b   : > { %1576 = vst [vmem:[%s1720_s18 + $0x208] sm:$0xff] %v1149_v37 }
 0x13c   : > { %1578 = vst [vmem:[%s1720_s18 + $0x218] sm:$0xff] %v1149_v37 }
 0x13d   : > { %1580 = vst [vmem:[%s1720_s18 + $0x228] sm:$0xff] %v1149_v37 }
 0x13e   : > { %1582 = vst [vmem:[%s1720_s18 + $0x238] sm:$0xff] %v1149_v37 }
 0x13f PF: > { %s14_s15 = sadd.s32 1, %s1618_s15  }
 0x140   : > { %p11_p4 = scmp.ge.s32.totalorder %s14_s15, 4  }
 0x142   :  { %13 = sbr.rel (!%p11_p4) target bundleno = 1 (0x1), region = 85 }

</bundles_post_ra>
